<compile_context>
chip_gen: v7x
topology: tpu7x:2x2x1
jax: 0.10.0
libtpu: 0.0.40
codegen_flags: <defaults>
</compile_context>

<pallas_src>
import functools

import jax
import jax.numpy as jnp
from jax.experimental import pallas as pl
from jax.experimental.pallas import tpu as pltpu


def _cdiv(a: int, b: int) -> int:
    return -(-a // b)


def _round_up(a: int, b: int) -> int:
    return _cdiv(a, b) * b


def _finalize_stats(s, q, mean_p, var, w, *, alpha, n_valid, num_feature,
                    pack, pad_rows):
    """Combine centered (1, Fp) sums into the running-stat update + packed scale.

    s, q : (1, Fp) sum / sum-of-squares of (x - old_mean), including `pad_rows`
           zero-padded rows whose contribution is removed analytically below.
    Returns new_mean, new_var, new_std as (1, F) and scale_p as (1, Fp).
    """
    F = num_feature
    s_f = s[:, :F]
    q_f = q[:, :F]
    for k in range(1, pack):                      # fold the packed lane groups
        lo = k * F
        s_f = s_f + s[:, lo:lo + F]
        q_f = q_f + q[:, lo:lo + F]

    m = mean_p[:, :F]                             # old running mean, (1, F)
    if pad_rows:
        # A zero-padded row contributed (0 - m) to s and m^2 to q; remove it.
        s_f = s_f + float(pad_rows) * m
        q_f = q_f - float(pad_rows) * (m * m)

    inv_n = 1.0 / float(n_valid)                  # divide by the *true* row count
    exc = s_f * inv_n                             # E[x - m_old]
    ex2c = q_f * inv_n                            # E[(x - m_old)^2]

    new_mean = alpha * m + (1.0 - alpha) * (m + exc)
    d = new_mean - m
    # mean((x - new_mean)^2) from moments centered at the old mean (no mean^2-sized
    # cancellation); clamp so the blend / sqrt can never see a negative value.
    var_upd = jnp.maximum(ex2c - 2.0 * d * exc + d * d, 0.0)
    new_var = alpha * var + (1.0 - alpha) * var_upd
    new_std = jnp.sqrt(new_var + 1e-10)

    # scale = relu(w) / std, computed ONCE here (a single (1, F) vreg, off the hot
    # path) and emitted lane-packed so the output write is one broadcast multiply
    # per element.  (lax.rsqrt would also work; the exact divide matches the
    # reference most closely and costs nothing in the finalize.)
    scale = jnp.maximum(w, 0.0) / new_std
    scale_p = jnp.concatenate([scale] * pack, axis=1) if pack > 1 else scale
    return new_mean, new_var, new_std, scale_p


def _stats_kernel(xs_ref, mean_p_ref, var_ref, w_ref,
                  new_mean_ref, new_var_ref, new_std_ref, scale_ref,
                  sum_acc, sq_acc,
                  *, alpha, n_valid, num_feature, pack, pad_rows):
    """Pass 1: tiled running-stat reduction; finalize also emits the scale row."""
    i = pl.program_id(0)

    @pl.when(i == 0)
    def _init():
        sum_acc[...] = jnp.zeros_like(sum_acc)
        sq_acc[...] = jnp.zeros_like(sq_acc)

    x = xs_ref[...].astype(jnp.float32)           # (tile_rows/8, 8, Fp)
    xc = x - mean_p_ref[...]                      # center at the old running mean
    # (8, Fp) accumulators: the per-step reduction over the leading axis is
    # vreg-aligned VALU adds; the sublane (XLU) fold happens once, in finalize.
    sum_acc[...] += jnp.sum(xc, axis=0)
    sq_acc[...] += jnp.sum(xc * xc, axis=0)

    @pl.when(i == pl.num_programs(0) - 1)
    def _finalize():
        s = jnp.sum(sum_acc[...], axis=0, keepdims=True)   # (1, Fp)
        q = jnp.sum(sq_acc[...], axis=0, keepdims=True)
        nm, nv, ns, sc = _finalize_stats(
            s, q, mean_p_ref[...], var_ref[...], w_ref[...],
            alpha=alpha, n_valid=n_valid, num_feature=num_feature,
            pack=pack, pad_rows=pad_rows)
        new_mean_ref[...] = nm
        new_var_ref[...] = nv
        new_std_ref[...] = ns
        scale_ref[...] = sc


def _scale_kernel(xs_ref, scale_ref, out_ref):
    """Pass 2: out = xs * (relu(w)/std) — one broadcast multiply, lane-dense stores."""
    x = xs_ref[...].astype(jnp.float32)           # (tile_rows/8, 8, Fp)
    out_ref[...] = (x * scale_ref[...]).astype(out_ref.dtype)


def _fused_kernel(xs_ref, mean_p_ref, var_ref, w_ref,
                  out_ref, new_mean_ref, new_var_ref, new_std_ref,
                  *, alpha, n_valid, num_feature, pack, pad_rows):
    """VMEM-resident path: stats + scaled output from one HBM read of xs."""
    x = xs_ref[...].astype(jnp.float32)           # (Np/8, 8, Fp), fully resident
    xc = x - mean_p_ref[...]
    s = jnp.sum(jnp.sum(xc, axis=0), axis=0, keepdims=True)        # (1, Fp)
    q = jnp.sum(jnp.sum(xc * xc, axis=0), axis=0, keepdims=True)
    nm, nv, ns, sc = _finalize_stats(
        s, q, mean_p_ref[...], var_ref[...], w_ref[...],
        alpha=alpha, n_valid=n_valid, num_feature=num_feature,
        pack=pack, pad_rows=pad_rows)
    new_mean_ref[...] = nm
    new_var_ref[...] = nv
    new_std_ref[...] = ns
    out_ref[...] = (x * sc).astype(out_ref.dtype)


def normalizer_forward(xs, mean, var, w, *, alpha=0.9,
                       fused_max_bytes=4 * 1024 * 1024,
                       target_block_bytes=2 * 1024 * 1024):
    """Training-mode Normalizer forward.

    xs: any shape flattening to (-1, F);  mean, var, w: (F,)
    Returns (out (N, F), new_mean (F,), new_var (F,), new_std (F,)).
    """
    F = w.shape[0]
    xs2d = xs.reshape(-1, F)
    N = xs2d.shape[0]
    out_dtype = xs2d.dtype

    # Lane packing: fold `pack` consecutive rows into the 128-lane dim.
    pack = 128 // F if (F <= 128 and 128 % F == 0) else 1
    Fp = F * pack
    Np_raw = _cdiv(N, pack)
    f32_row_bytes = Fp * 4

    fused = Np_raw * f32_row_bytes <= fused_max_bytes
    if fused:
        Np_pad = max(8, _round_up(Np_raw, 8))
        grid_steps = 1
        tile_rows = Np_pad
    else:
        # Bytes-based tiling: ~target_block_bytes per xs block, multiple-of-8 rows,
        # packed row count padded up by < 8*grid_steps rows (tiny).
        cap = max(8, (target_block_bytes // f32_row_bytes) // 8 * 8)
        grid_steps = _cdiv(Np_raw, cap)
        tile_rows = _round_up(_cdiv(Np_raw, grid_steps), 8)
        Np_pad = tile_rows * grid_steps

    N_pad = Np_pad * pack
    pad_rows = N_pad - N
    xs_padded = jnp.pad(xs2d, ((0, pad_rows), (0, 0))) if pad_rows else xs2d
    # Free row-major reshape: (N_pad, F) -> (Np_pad/8, 8, F*pack); keeps stores
    # lane-dense (never falls back to pack=1) and sublane-aligned.
    xs3 = xs_padded.reshape(Np_pad // 8, 8, Fp)

    mean_f = mean.astype(jnp.float32).reshape(1, F)
    var_f = var.astype(jnp.float32).reshape(1, F)
    w_f = w.astype(jnp.float32).reshape(1, F)
    mean_p = jnp.tile(mean_f, (1, pack)) if pack > 1 else mean_f   # (1, Fp)

    stat_kwargs = dict(alpha=float(alpha), n_valid=N, num_feature=F,
                       pack=pack, pad_rows=pad_rows)
    vmem_limit = 32 * 1024 * 1024   # safe on v5e/v6e (128 MiB) and v7x (64 MiB)

    if fused:
        # ---- single kernel: stats + output, xs read from HBM exactly once ------
        out3, new_mean, new_var, new_std = pl.pallas_call(
            functools.partial(_fused_kernel, **stat_kwargs),
            out_shape=(
                jax.ShapeDtypeStruct(xs3.shape, out_dtype),
                jax.ShapeDtypeStruct((1, F), jnp.float32),
                jax.ShapeDtypeStruct((1, F), jnp.float32),
                jax.ShapeDtypeStruct((1, F), jnp.float32),
            ),
            compiler_params=pltpu.CompilerParams(vmem_limit_bytes=vmem_limit),
        )(xs3, mean_p, var_f, w_f)
    else:
        t8 = tile_rows // 8
        # ---- pass 1: tiled reduction -> running stats + packed scale row -------
        # TODO(synk): on v7x (2 TensorCores/chip) split this reduction across a
        # leading "parallel" core axis with per-core partials; a single "arbitrary"
        # axis keeps it on one core (fine on v5e/v6e, which have 1 TC/chip).
        new_mean, new_var, new_std, scale_p = pl.pallas_call(
            functools.partial(_stats_kernel, **stat_kwargs),
            out_shape=(
                jax.ShapeDtypeStruct((1, F), jnp.float32),
                jax.ShapeDtypeStruct((1, F), jnp.float32),
                jax.ShapeDtypeStruct((1, F), jnp.float32),
                jax.ShapeDtypeStruct((1, Fp), jnp.float32),
            ),
            grid=(grid_steps,),
            in_specs=[
                pl.BlockSpec((t8, 8, Fp), lambda i: (i, 0, 0)),
                pl.BlockSpec((1, Fp), lambda i: (0, 0)),
                pl.BlockSpec((1, F), lambda i: (0, 0)),
                pl.BlockSpec((1, F), lambda i: (0, 0)),
            ],
            out_specs=(
                pl.BlockSpec((1, F), lambda i: (0, 0)),
                pl.BlockSpec((1, F), lambda i: (0, 0)),
                pl.BlockSpec((1, F), lambda i: (0, 0)),
                pl.BlockSpec((1, Fp), lambda i: (0, 0)),
            ),
            scratch_shapes=[pltpu.VMEM((8, Fp), jnp.float32),
                            pltpu.VMEM((8, Fp), jnp.float32)],
            compiler_params=pltpu.CompilerParams(
                dimension_semantics=("arbitrary",),
                vmem_limit_bytes=vmem_limit),
        )(xs3, mean_p, var_f, w_f)

        # ---- pass 2: streaming scale; consumes scale_p straight from pass 1 ----
        # (input_output_aliases={0: 0} would drop the extra HBM buffer if the
        # caller donated xs; left off so xs stays valid for the caller.)
        out3 = pl.pallas_call(
            _scale_kernel,
            out_shape=jax.ShapeDtypeStruct(xs3.shape, out_dtype),
            grid=(grid_steps,),
            in_specs=[
                pl.BlockSpec((t8, 8, Fp), lambda i: (i, 0, 0)),
                pl.BlockSpec((1, Fp), lambda i: (0, 0)),
            ],
            out_specs=pl.BlockSpec((t8, 8, Fp), lambda i: (i, 0, 0)),
            compiler_params=pltpu.CompilerParams(
                dimension_semantics=("parallel",),
                vmem_limit_bytes=vmem_limit),
        )(xs3, scale_p)

    out = out3.reshape(N_pad, F)
    if pad_rows:
        out = out[:N]
    return out, new_mean.reshape(F), new_var.reshape(F), new_std.reshape(F)


def normalizer_forward_ref(xs, mean, var, w, *, alpha=0.9):
    """Pure-JAX reference mirroring the PyTorch training-mode forward."""
    F = w.shape[0]
    xs2d = xs.reshape(-1, F).astype(jnp.float32)
    mean_update = jnp.mean(xs2d, axis=0)
    new_mean = alpha * mean + (1.0 - alpha) * mean_update
    var_update = (1.0 - alpha) * jnp.mean((xs2d - new_mean) ** 2, axis=0)
    new_var = alpha * var + var_update
    new_std = jnp.sqrt(new_var + 1e-10)
    out = (xs2d / new_std) * jnp.maximum(w, 0.0)
    return out, new_mean, new_var, new_std


if __name__ == "__main__":
    num_feature = 32
    alpha = 0.9
    key = jax.random.PRNGKey(0)

    # --- test 1: module-default buffers, tiny input (fused VMEM-resident path) ---
    w = jnp.ones((num_feature,), jnp.float32)      # nn.Parameter(torch.ones(F))
    # b = jnp.zeros((num_feature,), jnp.float32)   # unused in forward
    mean = jnp.zeros((num_feature,), jnp.float32)  # reset_stats: mean = 0
    var = jnp.ones((num_feature,), jnp.float32)    # reset_stats: var = 1
    x = jax.random.normal(key, (2, 8, num_feature), dtype=jnp.float32)  # -> (16, 32)

    out, nm, nv, ns = normalizer_forward(x, mean, var, w, alpha=alpha)
    jax.block_until_ready(out)
    r_out, r_m, r_v, r_s = normalizer_forward_ref(x, mean, var, w, alpha=alpha)
    assert jnp.allclose(out, r_out, atol=1e-5, rtol=1e-5)
    assert jnp.allclose(nm, r_m, atol=1e-5, rtol=1e-5)
    assert jnp.allclose(nv, r_v, atol=1e-5, rtol=1e-5)
    assert jnp.allclose(ns, r_s, atol=1e-5, rtol=1e-5)

    # --- test 2: warmed-up buffers + ragged row count, forced tiled two-pass path
    k1, k2, k3, k4 = jax.random.split(key, 4)
    x2 = 0.5 + 1.5 * jax.random.normal(k1, (125, 32, num_feature), dtype=jnp.float32)
    mean2 = 0.5 + 0.3 * jax.random.normal(k2, (num_feature,), dtype=jnp.float32)
    var2 = 0.5 + jnp.abs(jax.random.normal(k3, (num_feature,), dtype=jnp.float32))
    w2 = jax.random.normal(k4, (num_feature,), dtype=jnp.float32)   # exercises relu(w)
    out2, nm2, nv2, ns2 = normalizer_forward(
        x2, mean2, var2, w2, alpha=alpha,
        fused_max_bytes=64 * 1024, target_block_bytes=128 * 1024)
    jax.block_until_ready(out2)
    refs2 = normalizer_forward_ref(x2, mean2, var2, w2, alpha=alpha)
    for got, ref in zip((out2, nm2, nv2, ns2), refs2):
        assert jnp.allclose(got, ref, atol=1e-4, rtol=1e-4)

    print("KERNEL_OK")
</pallas_src>

<mosaic_0001>
module attributes {stable_mosaic.version = 11 : i64} {
  func.func @_fused_kernel(%arg0: memref<1x8x128xf32, #tpu.memory_space<vmem>>, %arg1: memref<1x128xf32, #tpu.memory_space<vmem>>, %arg2: memref<1x32xf32, #tpu.memory_space<vmem>>, %arg3: memref<1x32xf32, #tpu.memory_space<vmem>>, %arg4: memref<1x8x128xf32, #tpu.memory_space<vmem>>, %arg5: memref<1x32xf32, #tpu.memory_space<vmem>>, %arg6: memref<1x32xf32, #tpu.memory_space<vmem>>, %arg7: memref<1x32xf32, #tpu.memory_space<vmem>>) attributes {dimension_semantics = [], scalar_prefetch = 0 : i64, scratch_operands = 0 : i64, tpu.core_type = #tpu.core_type<tc>} {
    %c0 = arith.constant 0 : index
    %c0_0 = arith.constant 0 : index
    %c0_1 = arith.constant 0 : index
    %0 = vector.load %arg0[%c0, %c0_0, %c0_1] : memref<1x8x128xf32, #tpu.memory_space<vmem>>, vector<1x8x128xf32>
    %c0_2 = arith.constant 0 : index
    %c0_3 = arith.constant 0 : index
    %1 = vector.load %arg1[%c0_2, %c0_3] : memref<1x128xf32, #tpu.memory_space<vmem>>, vector<1x128xf32>
    %2 = vector.shape_cast %1 : vector<1x128xf32> to vector<1x1x128xf32>
    %3 = vector.broadcast %2 : vector<1x1x128xf32> to vector<1x8x128xf32>
    %4 = arith.subf %0, %3 : vector<1x8x128xf32>
    %cst = arith.constant dense<0.000000e+00> : vector<8x128xf32>
    %5 = vector.multi_reduction <add>, %4, %cst [0] : vector<1x8x128xf32> to vector<8x128xf32>
    %cst_4 = arith.constant dense<0.000000e+00> : vector<128xf32>
    %6 = vector.multi_reduction <add>, %5, %cst_4 [0] : vector<8x128xf32> to vector<128xf32>
    %7 = vector.shape_cast %6 : vector<128xf32> to vector<1x128xf32>
    %8 = arith.mulf %4, %4 : vector<1x8x128xf32>
    %cst_5 = arith.constant dense<0.000000e+00> : vector<8x128xf32>
    %9 = vector.multi_reduction <add>, %8, %cst_5 [0] : vector<1x8x128xf32> to vector<8x128xf32>
    %cst_6 = arith.constant dense<0.000000e+00> : vector<128xf32>
    %10 = vector.multi_reduction <add>, %9, %cst_6 [0] : vector<8x128xf32> to vector<128xf32>
    %11 = vector.shape_cast %10 : vector<128xf32> to vector<1x128xf32>
    %c0_7 = arith.constant 0 : index
    %c0_8 = arith.constant 0 : index
    %12 = vector.load %arg1[%c0_7, %c0_8] : memref<1x128xf32, #tpu.memory_space<vmem>>, vector<1x128xf32>
    %c0_9 = arith.constant 0 : index
    %c0_10 = arith.constant 0 : index
    %13 = vector.load %arg2[%c0_9, %c0_10] : memref<1x32xf32, #tpu.memory_space<vmem>>, vector<1x32xf32>
    %c0_11 = arith.constant 0 : index
    %c0_12 = arith.constant 0 : index
    %14 = vector.load %arg3[%c0_11, %c0_12] : memref<1x32xf32, #tpu.memory_space<vmem>>, vector<1x32xf32>
    %15 = vector.extract_strided_slice %7 {offsets = [0, 0], sizes = [1, 32], strides = [1, 1]} : vector<1x128xf32> to vector<1x32xf32>
    %16 = vector.extract_strided_slice %11 {offsets = [0, 0], sizes = [1, 32], strides = [1, 1]} : vector<1x128xf32> to vector<1x32xf32>
    %17 = vector.extract_strided_slice %7 {offsets = [0, 32], sizes = [1, 32], strides = [1, 1]} : vector<1x128xf32> to vector<1x32xf32>
    %18 = arith.addf %15, %17 : vector<1x32xf32>
    %19 = vector.extract_strided_slice %11 {offsets = [0, 32], sizes = [1, 32], strides = [1, 1]} : vector<1x128xf32> to vector<1x32xf32>
    %20 = arith.addf %16, %19 : vector<1x32xf32>
    %21 = vector.extract_strided_slice %7 {offsets = [0, 64], sizes = [1, 32], strides = [1, 1]} : vector<1x128xf32> to vector<1x32xf32>
    %22 = arith.addf %18, %21 : vector<1x32xf32>
    %23 = vector.extract_strided_slice %11 {offsets = [0, 64], sizes = [1, 32], strides = [1, 1]} : vector<1x128xf32> to vector<1x32xf32>
    %24 = arith.addf %20, %23 : vector<1x32xf32>
    %25 = vector.extract_strided_slice %7 {offsets = [0, 96], sizes = [1, 32], strides = [1, 1]} : vector<1x128xf32> to vector<1x32xf32>
    %26 = arith.addf %22, %25 : vector<1x32xf32>
    %27 = vector.extract_strided_slice %11 {offsets = [0, 96], sizes = [1, 32], strides = [1, 1]} : vector<1x128xf32> to vector<1x32xf32>
    %28 = arith.addf %24, %27 : vector<1x32xf32>
    %29 = vector.extract_strided_slice %12 {offsets = [0, 0], sizes = [1, 32], strides = [1, 1]} : vector<1x128xf32> to vector<1x32xf32>
    %cst_13 = arith.constant 1.600000e+01 : f32
    %30 = vector.broadcast %cst_13 : f32 to vector<1x32xf32>
    %31 = arith.mulf %30, %29 : vector<1x32xf32>
    %32 = arith.addf %26, %31 : vector<1x32xf32>
    %33 = arith.mulf %29, %29 : vector<1x32xf32>
    %cst_14 = arith.constant 1.600000e+01 : f32
    %34 = vector.broadcast %cst_14 : f32 to vector<1x32xf32>
    %35 = arith.mulf %34, %33 : vector<1x32xf32>
    %36 = arith.subf %28, %35 : vector<1x32xf32>
    %cst_15 = arith.constant 6.250000e-02 : f32
    %37 = vector.broadcast %cst_15 : f32 to vector<1x32xf32>
    %38 = arith.mulf %32, %37 : vector<1x32xf32>
    %cst_16 = arith.constant 6.250000e-02 : f32
    %39 = vector.broadcast %cst_16 : f32 to vector<1x32xf32>
    %40 = arith.mulf %36, %39 : vector<1x32xf32>
    %cst_17 = arith.constant 0.899999976 : f32
    %41 = vector.broadcast %cst_17 : f32 to vector<1x32xf32>
    %42 = arith.mulf %41, %29 : vector<1x32xf32>
    %43 = arith.addf %29, %38 : vector<1x32xf32>
    %cst_18 = arith.constant 1.000000e-01 : f32
    %44 = vector.broadcast %cst_18 : f32 to vector<1x32xf32>
    %45 = arith.mulf %44, %43 : vector<1x32xf32>
    %46 = arith.addf %42, %45 : vector<1x32xf32>
    %47 = arith.subf %46, %29 : vector<1x32xf32>
    %cst_19 = arith.constant 2.000000e+00 : f32
    %48 = vector.broadcast %cst_19 : f32 to vector<1x32xf32>
    %49 = arith.mulf %48, %47 : vector<1x32xf32>
    %50 = arith.mulf %49, %38 : vector<1x32xf32>
    %51 = arith.subf %40, %50 : vector<1x32xf32>
    %52 = arith.mulf %47, %47 : vector<1x32xf32>
    %53 = arith.addf %51, %52 : vector<1x32xf32>
    %cst_20 = arith.constant 0.000000e+00 : f32
    %54 = vector.broadcast %cst_20 : f32 to vector<1x32xf32>
    %55 = arith.maximumf %53, %54 : vector<1x32xf32>
    %cst_21 = arith.constant 0.899999976 : f32
    %56 = vector.broadcast %cst_21 : f32 to vector<1x32xf32>
    %57 = arith.mulf %56, %13 : vector<1x32xf32>
    %cst_22 = arith.constant 1.000000e-01 : f32
    %58 = vector.broadcast %cst_22 : f32 to vector<1x32xf32>
    %59 = arith.mulf %58, %55 : vector<1x32xf32>
    %60 = arith.addf %57, %59 : vector<1x32xf32>
    %cst_23 = arith.constant 1.000000e-10 : f32
    %61 = vector.broadcast %cst_23 : f32 to vector<1x32xf32>
    %62 = arith.addf %60, %61 : vector<1x32xf32>
    %63 = math.sqrt %62 : vector<1x32xf32>
    %cst_24 = arith.constant 0.000000e+00 : f32
    %64 = vector.broadcast %cst_24 : f32 to vector<1x32xf32>
    %65 = arith.maximumf %14, %64 : vector<1x32xf32>
    %66 = arith.divf %65, %63 : vector<1x32xf32>
    %67 = tpu.concatenate %66, %66, %66, %66 in 1 : vector<1x32xf32>, vector<1x32xf32>, vector<1x32xf32>, vector<1x32xf32> -> vector<1x128xf32>
    %c0_25 = arith.constant 0 : index
    %c0_26 = arith.constant 0 : index
    %68 = vector.load %arg5[%c0_25, %c0_26] : memref<1x32xf32, #tpu.memory_space<vmem>>, vector<1x32xf32>
    tpu.vector_store %arg5[%c0_25, %c0_26], %46 {strides = array<i32>} : memref<1x32xf32, #tpu.memory_space<vmem>>, vector<1x32xf32>,
    %c0_27 = arith.constant 0 : index
    %c0_28 = arith.constant 0 : index
    %69 = vector.load %arg6[%c0_27, %c0_28] : memref<1x32xf32, #tpu.memory_space<vmem>>, vector<1x32xf32>
    tpu.vector_store %arg6[%c0_27, %c0_28], %60 {strides = array<i32>} : memref<1x32xf32, #tpu.memory_space<vmem>>, vector<1x32xf32>,
    %c0_29 = arith.constant 0 : index
    %c0_30 = arith.constant 0 : index
    %70 = vector.load %arg7[%c0_29, %c0_30] : memref<1x32xf32, #tpu.memory_space<vmem>>, vector<1x32xf32>
    tpu.vector_store %arg7[%c0_29, %c0_30], %63 {strides = array<i32>} : memref<1x32xf32, #tpu.memory_space<vmem>>, vector<1x32xf32>,
    %71 = vector.shape_cast %67 : vector<1x128xf32> to vector<1x1x128xf32>
    %72 = vector.broadcast %71 : vector<1x1x128xf32> to vector<1x8x128xf32>
    %73 = arith.mulf %0, %72 : vector<1x8x128xf32>
    %c0_31 = arith.constant 0 : index
    %c0_32 = arith.constant 0 : index
    %c0_33 = arith.constant 0 : index
    %74 = vector.load %arg4[%c0_31, %c0_32, %c0_33] : memref<1x8x128xf32, #tpu.memory_space<vmem>>, vector<1x8x128xf32>
    tpu.vector_store %arg4[%c0_31, %c0_32, %c0_33], %73 {strides = array<i32>} : memref<1x8x128xf32, #tpu.memory_space<vmem>>, vector<1x8x128xf32>,
    return
  }
}

</mosaic_0001>

<bundles_post_ra>
// kernel: tpu_custom_call.1
= control target key start
LH: loop header
LB: loop body
LE: loop exit
PB: predicated region body
PF: predicated region fallthrough
CT: control target
= control target key end

     0   :  { %13 = vsyncpa [#allocation3], 0  ;;  %s474_s0 = inlined_call_operand.hbm [shape: f32[1,8,128], index: 0, kind: input, shape index: {}]   ;;  %s475_s1 = inlined_call_operand.vmem [shape: f32[1,128], index: 1, kind: input, shape index: {}]   ;;  %s476_s2 = inlined_call_operand.vmem [shape: f32[1,32], index: 2, kind: input, shape index: {}]   ;;  %s477_s3 = inlined_call_operand.vmem [shape: f32[1,32], index: 3, kind: input, shape index: {}]   ;;  %s478_s4 = inlined_call_operand.hbm [shape: f32[1,8,128], index: 4, kind: output, shape index: {0}]   ;;  %s479_s5 = inlined_call_operand.hbm [shape: f32[1,32], index: 5, kind: output, shape index: {1}]   ;;  %s480_s6 = inlined_call_operand.hbm [shape: f32[1,32], index: 6, kind: output, shape index: {2}]   ;;  %s481_s7 = inlined_call_operand.hbm [shape: f32[1,32], index: 7, kind: output, shape index: {3}]  }
   0x1   :  { %14 = vsyncpa [#allocation4], 0 }
   0x2   :  { %15 = vsyncpa [#allocation7], 0 }
   0x3   :  { %16 = vsyncpa [#allocation10], 0  ;;  %s336_s24 = smov [#allocation2]   ;;  %s218_s28 = scalar_lea.hbm %s474_s0, 128 }
   0x4   :  { %s23_s25 = sshll.u32 %s336_s24, 4  ;;  %p219_p0 = scmp.ne.s32.totalorder %s474_s0, %s218_s28  ;;  %s24_s25 = int_to_ptr.vmem [resolvable:$true] %s23_s25 }
   0x5   :  { %p222_p1 = scmp.lt.u32.totalorder %s218_s28, %s474_s0 }
   0x7   :  { %p224_p2 = pnand %p222_p1, %p219_p0 }
   0x9   :  { %227 = shalt.err (!%p224_p2)
}
   0xa   :  { %s228_s10 = scalar_lea.vmem %s24_s25, 128  ;;  %p233_p4 = scmp.lt.s32.totalorder %s24_s25, %s24_s25 }
   0xb   :  { %p229_p3 = scmp.ne.s32.totalorder %s24_s25, %s228_s10  ;;  %p234_p5 = scmp.lt.s32.totalorder %s228_s10, %s228_s10 }
   0xd   :  { %p235_p6 = por %p234_p5, %p233_p4 }
   0xf   :  { %p236_p7 = pnand %p235_p6, %p229_p3 }
  0x11   :  { %239 = shalt.err (!%p236_p7)
}
  0x12   :  { %26 = dma.hbm_to_vmem [thread:$0]  %s474_s0, 128, %s24_s25, [#allocation3]  }
  0x13   :  { %328 = dma.done.wait [#allocation3], 128  }
  0x14   :  { %329 = vsyncadd [#allocation3], 4294967168  ;;  %v39_v0 = vlaneseq  ;;  %v398_v3 = vld [vmem:[#allocation2] sm:$0xff]  ;;  %s337_s0 = smov 96   ;;  %s339_s15 = smov 64   ;;  %vm140_vm0 = vcmask 253952  }
  0x15   :  { %v37_v4 = vld [vmem:[%s475_s1] sm:$0x1]  ;;  %s338_s1 = smov 32   ;;  %s340_s19 = smov [#allocation6]  }
  0x16   :  { %v40_v1 = vshrl.u32 %v39_v0, 7  ;;  %v88_v26 = vmul.f32 16.0, %v37_v4  ;;  %v90_v32 = vmul.f32 %v37_v4, %v37_v4  ;;  %v95_v35 = vmul.f32 0.9, %v37_v4  ;;  %v60_v48 = vld [vmem:[%s476_s2] sm:$0x1] }
  0x17   :  { %v106_v50 = vmul.f32 0.9, %v60_v48  ;;  %v61_v60 = vld [vmem:[%s477_s3] sm:$0x1]  ;;  %s166_s20 = sshll.u32 %s340_s19, 4  ;;  %s167_s20 = int_to_ptr.vmem [resolvable:$true] %s166_s20 }
  0x18   :  { %v396_v2 = vsub.s32 0, %v40_v1  ;;  %v91_v37 = vmul.f32 16.0, %v90_v32  ;;  %v117_v61 = vmax.f32 %v61_v60, 0.0  ;;  %s240_s21 = scalar_lea.vmem %s167_s20, 16  ;;  %s244_s22 = scalar_lea.vmem %s167_s20, 32 }
  0x19   :  { %p241_p8 = scmp.ne.s32.totalorder %s167_s20, %s240_s21  ;;  %p245_p9 = scmp.lt.s32.totalorder %s167_s20, %s167_s20 }
  0x1a   :  { %v42_v5 = vrot.slane %v37_v4, %v396_v2  ;;  %p246_p10 = scmp.lt.s32.totalorder %s244_s22, %s240_s21 }
  0x1c   :  { %v44_v6 = vsub.f32 %v398_v3, %v42_v5  ;;  %p247_p11 = por %p246_p10, %p245_p9 }
  0x1e   :  { %v46_v7 = vrot.slane %v44_v6, 4  ;;  %v52_v8 = vmul.f32 %v44_v6, %v44_v6  ;;  %p248_p12 = pnand %p247_p11, %p241_p8 }
  0x20   :  { %v47_v9 = vadd.f32 %v46_v7, %v44_v6  ;;  %v54_v10 = vrot.slane %v52_v8, 4 }
  0x22   :  { %v48_v11 = vrot.slane %v47_v9, 2  ;;  %v55_v12 = vadd.f32 %v54_v10, %v52_v8 }
  0x24   :  { %v49_v13 = vadd.f32 %v48_v11, %v47_v9  ;;  %v56_v14 = vrot.slane %v55_v12, 2 }
  0x26   :  { %v50_v15 = vrot.slane %v49_v13, 1  ;;  %v57_v16 = vadd.f32 %v56_v14, %v55_v12 }
  0x28   :  { %v51_v17 = vadd.f32 %v50_v15, %v49_v13  ;;  %v58_v18 = vrot.slane %v57_v16, 1 }
  0x2a   :  { %63 = vrot.lane.b32.xlu0 %v51_v17, %s337_s0  ;;  %80 = vrot.lane.b32.xlu1 %v51_v17, %s338_s1  ;;  %v59_v19 = vadd.f32 %v58_v18, %v57_v16 }
  0x2e   :  { %72 = vrot.lane.b32.xlu0 %v51_v17, %s339_s15  ;;  %68 = vrot.lane.b32.xlu1 %v59_v19, %s337_s0 }
  0x32   :  { %76 = vrot.lane.b32.xlu0 %v59_v19, %s339_s15  ;;  %84 = vrot.lane.b32.xlu1 %v59_v19, %s338_s1 }
  0x9c   :  { %v64_v20 = vpop.permute.xlu0 %63  ;;  %v81_v21 = vpop.permute.xlu1 %80 }
  0x9d   :  { %v66_v22 = vadd.f32 %v64_v20, %v51_v17 }
  0xa0   :  { %v73_v23 = vpop.permute.xlu0 %72  ;;  %v69_v24 = vpop.permute.xlu1 %68 }
  0xa1   :  { %v75_v25 = vadd.f32 %v73_v23, %v66_v22  ;;  %v71_v27 = vadd.f32 %v69_v24, %v59_v19 }
  0xa3   :  { %v83_v28 = vadd.f32 %v81_v21, %v75_v25 }
  0xa4   :  { %v77_v29 = vpop.permute.xlu0 %76  ;;  %v85_v33 = vpop.permute.xlu1 %84 }
  0xa5   :  { %v89_v30 = vadd.f32 %v88_v26, %v83_v28  ;;  %v79_v31 = vadd.f32 %v77_v29, %v71_v27 }
  0xa7   :  { %v93_v34 = vmul.f32 0.0625, %v89_v30  ;;  %v87_v38 = vadd.f32 %v85_v33, %v79_v31 }
  0xa9   :  { %v96_v36 = vadd.f32 %v93_v34, %v37_v4  ;;  %v92_v41 = vsub.f32 %v87_v38, %v91_v37 }
  0xab   :  { %v97_v39 = vmul.f32 0.1, %v96_v36  ;;  %v94_v44 = vmul.f32 0.0625, %v92_v41 }
  0xad   :  { %v98_v40 = vadd.f32 %v97_v39, %v95_v35 }
  0xaf   :  { %v99_v42 = vsub.f32 %v98_v40, %v37_v4  ;;  %141 = vst.msk [vmem:[#allocation6] sm:$0x1] %vm140_vm0, %v98_v40 }
  0xb1   :  { %v100_v43 = vmul.f32 2.0, %v99_v42  ;;  %v103_v47 = vmul.f32 %v99_v42, %v99_v42 }
  0xb3   :  { %v101_v45 = vmul.f32 %v100_v43, %v93_v34 }
  0xb5   :  { %v102_v46 = vsub.f32 %v94_v44, %v101_v45 }
  0xb7   :  { %v104_v49 = vadd.f32 %v103_v47, %v102_v46 }
  0xb9   :  { %v105_v51 = vmax.f32 %v104_v49, 0.0 }
  0xbb   :  { %v107_v52 = vmul.f32 0.1, %v105_v51 }
  0xbd   :  { %v108_v53 = vadd.f32 %v107_v52, %v106_v50 }
  0xbf   :  { %v109_v54 = vadd.f32 1e-10, %v108_v53  ;;  %142 = vst.msk [vmem:[#allocation8] sm:$0x1] %vm140_vm0, %v108_v53 }
  0xc1   :  { %214 = vrsqrt.f32 %v109_v54  ;;  %vm112_vm1 = vcmp.eq.f32.partialorder %v109_v54, inf  ;;  %v115_v57 = vand.u32 2147483648, %v109_v54  ;;  %vm114_vm2 = vcmp.eq.f32.partialorder %v109_v54, 0.0 }
  0xcb   :  { %v215_v55 = vpop.eup %214 }
  0xcc   :  { %v111_v56 = vmul.f32 %v215_v55, %v109_v54 }
  0xce   :  { %v113_v58 = vsel %vm112_vm1, %v109_v54, %v111_v56 }
  0xcf   :  { %v116_v59 = vsel %vm114_vm2, %v115_v57, %v113_v58 }
  0xd0   :  { %216 = vrcp.f32 %v116_v59  ;;  %143 = vst.msk [vmem:[#allocation9] sm:$0x1] %vm140_vm0, %v116_v59 }
  0xda   :  { %v217_v62 = vpop.eup %216 }
  0xdb   :  { %251 = shalt.err (!%p248_p12)
}
  0xdc   :  { %s252_s25 = scalar_lea.hbm %s479_s5, 16 }
  0xdd   :  { %p253_p13 = scmp.ne.s32.totalorder %s479_s5, %s252_s25  ;;  %p256_p0 = scmp.lt.u32.totalorder %s252_s25, %s479_s5 }
  0xdf   :  { %p258_p1 = pnand %p256_p0, %p253_p13 }
  0xe1   :  { %261 = shalt.err (!%p258_p1)
}
  0xe2   :  { %169 = dma.vmem_to_hbm [thread:$0]  %s167_s20, 16, %s479_s5, [#allocation7]   ;;  %v119_v63 = vmul.f32 %v217_v62, %v117_v61 }
  0xe3   :  { %s341_s8 = smov [#allocation8]  }
  0xe4   :  { %s176_s9 = sshll.u32 %s341_s8, 4  ;;  %v124_v0 = vrot.slane %v119_v63, %v396_v2  ;;  %s177_s9 = int_to_ptr.vmem [resolvable:$true] %s176_s9 }
  0xe5   :  { %s262_s10 = scalar_lea.vmem %s177_s9, 16  ;;  %s266_s11 = scalar_lea.vmem %s177_s9, 32 }
  0xe6   :  { %p263_p2 = scmp.ne.s32.totalorder %s177_s9, %s262_s10  ;;  %p267_p3 = scmp.lt.s32.totalorder %s177_s9, %s177_s9 }
  0xe7   :  { %p268_p4 = scmp.lt.s32.totalorder %s266_s11, %s262_s10 }
  0xe9   :  { %p269_p5 = por %p268_p4, %p267_p3 }
  0xeb   :  { %p270_p6 = pnand %p269_p5, %p263_p2 }
  0xed   :  { %273 = shalt.err (!%p270_p6)
}
  0xee   :  { %s274_s14 = scalar_lea.hbm %s480_s6, 16 }
  0xef   :  { %p275_p7 = scmp.ne.s32.totalorder %s480_s6, %s274_s14  ;;  %p278_p8 = scmp.lt.u32.totalorder %s274_s14, %s480_s6 }
  0xf1   :  { %p280_p9 = pnand %p278_p8, %p275_p7 }
  0xf3   :  { %283 = shalt.err (!%p280_p9)
}
  0xf4   :  { %179 = dma.vmem_to_hbm [thread:$0]  %s177_s9, 16, %s480_s6, [#allocation7]   ;;  %128 = vrot.lane.b32.xlu1 %v124_v0, %s339_s15  ;;  %125 = vrot.lane.b32.xlu0 %v124_v0, %s338_s1 }
  0xf5   :  { %s342_s20 = smov [#allocation9]  }
  0xf6   :  { %s186_s21 = sshll.u32 %s342_s20, 4  ;;  %s187_s21 = int_to_ptr.vmem [resolvable:$true] %s186_s21 }
  0xf7   :  { %s284_s22 = scalar_lea.vmem %s187_s21, 16  ;;  %s288_s23 = scalar_lea.vmem %s187_s21, 32 }
  0xf8   :  { %p285_p10 = scmp.ne.s32.totalorder %s187_s21, %s284_s22  ;;  %p289_p11 = scmp.lt.s32.totalorder %s187_s21, %s187_s21 }
  0xf9   :  { %p290_p12 = scmp.lt.s32.totalorder %s288_s23, %s284_s22 }
  0xfb   :  { %p291_p13 = por %p290_p12, %p289_p11 }
  0xfd   :  { %p292_p0 = pnand %p291_p13, %p285_p10 }
  0xff   :  { %295 = shalt.err (!%p292_p0)
}
 0x100   :  { %s296_s26 = scalar_lea.hbm %s481_s7, 16 }
 0x101   :  { %p297_p1 = scmp.ne.s32.totalorder %s481_s7, %s296_s26  ;;  %p300_p2 = scmp.lt.u32.totalorder %s296_s26, %s481_s7 }
 0x103   :  { %p302_p3 = pnand %p300_p2, %p297_p1 }
 0x105   :  { %305 = shalt.err (!%p302_p3)
}
 0x106   :  { %189 = dma.vmem_to_hbm [thread:$0]  %s187_s21, 16, %s481_s7, [#allocation10]   ;;  %131 = vrot.lane.b32.xlu0 %v124_v0, %s337_s0  ;;  %vm134_vm3 = vcmask 261120   ;;  %vm136_vm4 = vcmask 523264   ;;  %vm138_vm5 = vcmask 785408  }
 0x107   :  { %s343_s29 = smov [#allocation5]  }
 0x108   :  { %s156_s30 = sshll.u32 %s343_s29, 4  ;;  %s157_s30 = int_to_ptr.vmem [resolvable:$true] %s156_s30 }
 0x109   :  { %s306_s7 = scalar_lea.vmem %s157_s30, 128  ;;  %p311_p5 = scmp.lt.s32.totalorder %s157_s30, %s157_s30 }
 0x10a   :  { %p307_p4 = scmp.ne.s32.totalorder %s157_s30, %s306_s7  ;;  %p312_p6 = scmp.lt.s32.totalorder %s306_s7, %s306_s7 }
 0x10c   :  { %p313_p7 = por %p312_p6, %p311_p5 }
 0x10e   :  { %p314_p8 = pnand %p313_p7, %p307_p4 }
 0x166   :  { %v126_v1 = vpop.permute.xlu0 %125  ;;  %v129_v4 = vpop.permute.xlu1 %128 }
 0x167   :  { %v135_v5 = vsel %vm134_vm3, %v119_v63, %v126_v1 }
 0x168   :  { %v137_v6 = vsel %vm136_vm4, %v135_v5, %v129_v4 }
 0x178   :  { %v132_v7 = vpop.permute.xlu0 %131 }
 0x179   :  { %v139_v8 = vsel %vm138_vm5, %v137_v6, %v132_v7 }
 0x17a   :  { %v147_v9 = vrot.slane %v139_v8, %v396_v2 }
 0x17c   :  { %v148_v10 = vmul.f32 %v147_v9, %v398_v3 }
 0x17e   :  { %149 = vst [vmem:[#allocation5] sm:$0xff] %v148_v10 }
 0x17f   :  { %317 = shalt.err (!%p314_p8)
}
 0x180   :  { %s318_s9 = scalar_lea.hbm %s478_s4, 128 }
 0x181   :  { %p319_p9 = scmp.ne.s32.totalorder %s478_s4, %s318_s9  ;;  %p322_p10 = scmp.lt.u32.totalorder %s318_s9, %s478_s4 }
 0x183   :  { %p324_p11 = pnand %p322_p10, %p319_p9 }
 0x185   :  { %327 = shalt.err (!%p324_p11)
}
 0x186   :  { %159 = dma.vmem_to_hbm [thread:$0]  %s157_s30, 128, %s478_s4, [#allocation4]  }
 0x187   :  { %330 = dma.done.wait [#allocation4], 128  }
 0x188   :  { %331 = vsyncadd [#allocation4], 4294967168 }
 0x189   :  { %332 = dma.done.wait [#allocation7], 32  }
 0x18a   :  { %333 = vsyncadd [#allocation7], 4294967264 }
 0x18b   :  { %334 = dma.done.wait [#allocation10], 16  }
 0x18c   :  { %335 = vsyncadd [#allocation10], 4294967280 }
 0x18d   :  { %202 = vsyncpa [#allocation3], 1 }
 0x18e   :  { %203 = vsyncpa [#allocation4], 1 }
 0x18f   :  { %204 = vsyncpa [#allocation7], 1 }
 0x190   :  { %205 = vsyncpa [#allocation10], 1 }

</bundles_post_ra>
